<compile_context>
chip_gen: v5e
topology: v5e:2x2
jax: 0.10.0
libtpu: 0.0.40
codegen_flags: <defaults>
</compile_context>

<pallas_src>
import functools

import jax
import jax.numpy as jnp
from jax.experimental import pallas as pl
from jax.experimental.pallas import tpu as pltpu

_LANE = 128     # vreg lane width (last dim)
_SUBLANE = 8    # vreg sublane count (second-to-last dim, f32)


def _copy_kernel(eeg_ref, mask_ref, eeg_out_ref, mask_out_ref):
    """Aligned path: the crop was already applied by the input BlockSpec/DMA."""
    eeg_out_ref[...] = eeg_ref[...]
    mask_out_ref[...] = mask_ref[...]


def _shifted_copy_kernel(eeg_ref, mask_ref, eeg_out_ref, mask_out_ref, *,
                         offset, size):
    """General path: static lane slice of the 128-aligned covering block."""
    eeg_out_ref[...] = eeg_ref[:, offset:offset + size]
    mask_out_ref[...] = mask_ref[:, offset:offset + size]


def _row_alignment(*dtypes):
    """Sublane alignment safe for all participating dtypes (packed sublanes)."""
    align = _SUBLANE
    for d in dtypes:
        packing = max(1, 4 // d.itemsize)   # f32 -> 1, bf16 -> 2, int8 -> 4
        align = max(align, _SUBLANE * packing)
    return align


def _pick_rows_tile(num_rows, bytes_per_row, budget_bytes, row_align,
                    max_rows=1024):
    """Largest row tile whose (double-buffered) in/out blocks fit the budget."""
    rows = max(1, budget_bytes // max(bytes_per_row, 1))
    rows = min(rows, num_rows, max_rows)
    if rows >= num_rows:
        return num_rows                       # full dim is always legal
    rows = max(row_align, (rows // row_align) * row_align)
    return min(num_rows, rows)


def _covering_block(start, size, t):
    """Smallest multiple-of-128 block width w (< t) such that the crop window
    [start, start+size) lies inside a single w-aligned block.  Returns
    (w, block_index); falls back to the full time axis if no smaller block
    works.  The chosen block always contains the full (in-bounds) window, so
    even a partial edge block never exposes padding to the kernel slice."""
    w = pl.cdiv(size, _LANE) * _LANE
    while w < t:
        idx = start // w
        if start + size <= (idx + 1) * w:
            return w, idx
        w += _LANE
    return t, 0


def eeg_time_cropping_transform(eeg, eeg_mask, *, start: int, size: int,
                                max_time_tile: int = 1024,
                                vmem_budget_bytes: int = 16 * 1024 * 1024):
    """Pallas equivalent of EegTimeCroppingTransform.forward.

    Args:
      eeg:      (b, c, t) array.
      eeg_mask: (b, c, t) array (any dtype; copied verbatim).
      start, size: static crop parameters (module __init__ args).

    Returns:
      (eeg_cropped, mask_cropped): both (b, c, size).
    """
    b, c, t = eeg.shape
    assert eeg_mask.shape == (b, c, t)
    assert 0 <= start and 0 < size and start + size <= t

    num_rows = b * c
    eeg2 = eeg.reshape(num_rows, t)          # free reshape (collapse b, c)
    mask2 = eeg_mask.reshape(num_rows, t)

    elem_bytes = eeg.dtype.itemsize + eeg_mask.dtype.itemsize
    row_align = _row_alignment(eeg.dtype, eeg_mask.dtype)

    out_shapes = (
        jax.ShapeDtypeStruct((num_rows, size), eeg.dtype),
        jax.ShapeDtypeStruct((num_rows, size), eeg_mask.dtype),
    )

    if start % _LANE == 0 and size >= _LANE:
        # ---- Aligned path: crop lives entirely in the input BlockSpec, so the
        # HBM read is exactly the cropped window (plus at most one partial
        # tail block whose extra columns are dropped by output masking). ----
        time_tile = min(max(_LANE, (max_time_tile // _LANE) * _LANE),
                        (size // _LANE) * _LANE)
        while start % time_tile != 0:        # need an integral input block offset
            time_tile -= _LANE               # terminates at 128 (start % 128 == 0)
        q = start // time_tile               # first input time-block of the crop

        # (in + out) blocks for 2 tensors, double-buffered.
        bytes_per_row = 2 * 2 * time_tile * elem_bytes
        rows_tile = _pick_rows_tile(num_rows, bytes_per_row,
                                    vmem_budget_bytes, row_align)

        grid = (pl.cdiv(num_rows, rows_tile), pl.cdiv(size, time_tile))
        in_specs = [
            pl.BlockSpec((rows_tile, time_tile), lambda i, j: (i, q + j)),
            pl.BlockSpec((rows_tile, time_tile), lambda i, j: (i, q + j)),
        ]
        out_specs = (
            pl.BlockSpec((rows_tile, time_tile), lambda i, j: (i, j)),
            pl.BlockSpec((rows_tile, time_tile), lambda i, j: (i, j)),
        )
        kernel = _copy_kernel
        dim_sem = ("parallel", "parallel")
    else:
        # ---- General path: read only the smallest 128-aligned block that
        # covers the crop window, then do one static lane slice in-kernel.
        # (An arbitrary unaligned element offset cannot be expressed with
        # Blocked index_maps, so we align the DMA and shift in registers.) ----
        window, widx = _covering_block(start, size, t)
        offset = start - widx * window       # static, 0 <= offset < window

        bytes_per_row = 2 * (window + size) * elem_bytes
        rows_tile = _pick_rows_tile(num_rows, bytes_per_row,
                                    vmem_budget_bytes, row_align)

        grid = (pl.cdiv(num_rows, rows_tile),)
        in_specs = [
            pl.BlockSpec((rows_tile, window), lambda i: (i, widx)),
            pl.BlockSpec((rows_tile, window), lambda i: (i, widx)),
        ]
        out_specs = (
            pl.BlockSpec((rows_tile, size), lambda i: (i, 0)),
            pl.BlockSpec((rows_tile, size), lambda i: (i, 0)),
        )
        kernel = functools.partial(_shifted_copy_kernel,
                                   offset=offset, size=size)
        dim_sem = ("parallel",)

    eeg_out, mask_out = pl.pallas_call(
        kernel,
        out_shape=out_shapes,
        grid=grid,
        in_specs=in_specs,
        out_specs=out_specs,
        compiler_params=pltpu.CompilerParams(dimension_semantics=dim_sem),
    )(eeg2, mask2)

    return eeg_out.reshape(b, c, size), mask_out.reshape(b, c, size)


if __name__ == "__main__":
    key = jax.random.PRNGKey(0)
    k1, k2, k3, k4, k5, k6 = jax.random.split(key, 6)

    def run_case(eeg, mask, start, size):
        fn = jax.jit(functools.partial(eeg_time_cropping_transform,
                                       start=start, size=size))
        eeg_out, mask_out = fn(eeg, mask)
        jax.block_until_ready((eeg_out, mask_out))
        b, c, _ = eeg.shape
        assert eeg_out.shape == (b, c, size) and mask_out.shape == (b, c, size)
        assert eeg_out.dtype == eeg.dtype and mask_out.dtype == mask.dtype
        assert jnp.array_equal(eeg_out, eeg[..., start:start + size])
        assert jnp.array_equal(mask_out, mask[..., start:start + size])

    # --- Case 1: small, lane-unaligned crop (module demo defaults).
    # Exercises the general (covering-block + static lane shift) path. ---
    B, C, T = 2, 4, 16
    eeg = jax.random.normal(k1, (B, C, T), dtype=jnp.float32)
    # Mask kept in a narrow dtype (bf16) to halve its HBM stream vs float32.
    eeg_mask = (jax.random.uniform(k2, (B, C, T)) > 0.5).astype(jnp.bfloat16)
    run_case(eeg, eeg_mask, start=4, size=8)

    # --- Case 2: lane-aligned crop -> crop expressed purely in the input
    # BlockSpec / DMA (only the cropped window is read from HBM). ---
    B2, C2, T2 = 2, 4, 512
    eeg_b = jax.random.normal(k3, (B2, C2, T2), dtype=jnp.float32)
    mask_b = (jax.random.uniform(k4, (B2, C2, T2)) > 0.5).astype(jnp.bfloat16)
    run_case(eeg_b, mask_b, start=128, size=256)

    # --- Case 3: lane-aligned start, size NOT a multiple of the time tile ->
    # exercises the masked partial output tail block on the aligned path. ---
    B3, C3, T3 = 2, 4, 4096
    eeg_c = jax.random.normal(k5, (B3, C3, T3), dtype=jnp.float32)
    mask_c = (jax.random.uniform(k6, (B3, C3, T3)) > 0.5).astype(jnp.bfloat16)
    run_case(eeg_c, mask_c, start=256, size=200)

    print("KERNEL_OK")
</pallas_src>

<mosaic_0001>
module attributes {stable_mosaic.version = 11 : i64} {
  func.func @_shifted_copy_kernel(%arg0: i32, %arg1: memref<8x16xf32, #tpu.memory_space<vmem>>, %arg2: memref<8x16xbf16, #tpu.memory_space<vmem>>, %arg3: memref<8x8xf32, #tpu.memory_space<vmem>>, %arg4: memref<8x8xbf16, #tpu.memory_space<vmem>>) attributes {dimension_semantics = [#tpu.dimension_semantics<parallel>], iteration_bounds = array<i64: 1>, scalar_prefetch = 0 : i64, scratch_operands = 0 : i64, tpu.core_type = #tpu.core_type<tc>, window_params = [{transform_indices = @transform_0, window_bounds = array<i64: 8, 16>}, {transform_indices = @transform_1, window_bounds = array<i64: 8, 16>}, {transform_indices = @transform_2, window_bounds = array<i64: 8, 8>}, {transform_indices = @transform_3, window_bounds = array<i64: 8, 8>}]} {
    %c0 = arith.constant 0 : index
    %c4 = arith.constant 4 : index
    %0 = vector.load %arg1[%c0, %c4] : memref<8x16xf32, #tpu.memory_space<vmem>>, vector<8x8xf32>
    %c0_0 = arith.constant 0 : index
    %c0_1 = arith.constant 0 : index
    %1 = vector.load %arg3[%c0_0, %c0_1] : memref<8x8xf32, #tpu.memory_space<vmem>>, vector<8x8xf32>
    tpu.vector_store %arg3[%c0_0, %c0_1], %0 {strides = array<i32>} : memref<8x8xf32, #tpu.memory_space<vmem>>, vector<8x8xf32>,
    %c0_2 = arith.constant 0 : index
    %c4_3 = arith.constant 4 : index
    %2 = vector.load %arg2[%c0_2, %c4_3] : memref<8x16xbf16, #tpu.memory_space<vmem>>, vector<8x8xbf16>
    %c0_4 = arith.constant 0 : index
    %c0_5 = arith.constant 0 : index
    %3 = vector.load %arg4[%c0_4, %c0_5] : memref<8x8xbf16, #tpu.memory_space<vmem>>, vector<8x8xbf16>
    tpu.vector_store %arg4[%c0_4, %c0_5], %2 {strides = array<i32>} : memref<8x8xbf16, #tpu.memory_space<vmem>>, vector<8x8xbf16>,
    return
  }
  func.func @transform_0(%arg0: i32) -> (i32, i32) {
    %c0_i32 = arith.constant 0 : i32
    %c0_i32_0 = arith.constant 0 : i32
    return %arg0, %c0_i32 : i32, i32
  }
  func.func @transform_1(%arg0: i32) -> (i32, i32) {
    %c0_i32 = arith.constant 0 : i32
    %c0_i32_0 = arith.constant 0 : i32
    return %arg0, %c0_i32 : i32, i32
  }
  func.func @transform_2(%arg0: i32) -> (i32, i32) {
    %c0_i32 = arith.constant 0 : i32
    %c0_i32_0 = arith.constant 0 : i32
    return %arg0, %c0_i32 : i32, i32
  }
  func.func @transform_3(%arg0: i32) -> (i32, i32) {
    %c0_i32 = arith.constant 0 : i32
    %c0_i32_0 = arith.constant 0 : i32
    return %arg0, %c0_i32 : i32, i32
  }
}

</mosaic_0001>

<bundles_post_ra>
// kernel: eeg_time_cropping_transform.1
= control target key start
LH: loop header
LB: loop body
LE: loop exit
PB: predicated region body
PF: predicated region fallthrough
CT: control target
= control target key end

     0   :  { %9 = vsyncpa [#allocation3], 0  ;;  %s237_s0 = inlined_call_operand.hbm [shape: f32[8,16], index: 0, kind: input, shape index: {}]   ;;  %s238_s1 = inlined_call_operand.hbm [shape: bf16[8,16], index: 1, kind: input, shape index: {}]   ;;  %s239_s2 = inlined_call_operand.hbm [shape: f32[8,8], index: 2, kind: output, shape index: {0}]   ;;  %s240_s3 = inlined_call_operand.hbm [shape: bf16[8,8], index: 3, kind: output, shape index: {1}]  }
   0x1   :  { %10 = vsyncpa [#allocation6], 0 }
   0x2   :  { %11 = vsyncpa [#allocation4], 0 }
   0x3   :  { %12 = vsyncpa [#allocation9], 0  ;;  %s18_s14 = sshll.u32 %s237_s0, 4  ;;  %s200_s15 = smov [#allocation2]   ;;  %s19_s14 = int_to_ptr.hbm [resolvable:$true] %s18_s14 }
   0x4   :  { %s20_s16 = sshll.u32 %s200_s15, 4  ;;  %s29_s19 = sshll.u32 %s238_s1, 4  ;;  %s21_s16 = int_to_ptr.vmem [resolvable:$true] %s20_s16  ;;  %s30_s19 = int_to_ptr.hbm [resolvable:$true] %s29_s19 }
   0x5   :  { %23 = dma.hbm_to_vmem [thread:$0]  %s19_s14, 128, %s21_s16, [#allocation3]  }
   0x6   :  { %s201_s20 = smov [#allocation5]  }
   0x7   :  { %s31_s21 = sshll.u32 %s201_s20, 4  ;;  %s32_s21 = int_to_ptr.vmem [resolvable:$true] %s31_s21 }
   0x8   :  { %34 = dma.hbm_to_vmem [thread:$0]  %s30_s19, 64, %s32_s21, [#allocation6]  }
   0x9   :  { %192 = dma.done.wait [#allocation3], 128  }
   0xa   :  { %193 = vsyncadd [#allocation3], 4294967168 }
   0xb   :  { %194 = dma.done.wait [#allocation6], 64  }
   0xc   :  { %195 = vsyncadd [#allocation6], 4294967232  ;;  %v43_v0 = vld [vmem:[#allocation2] sm:$0xff]  ;;  %s202_s0 = smov 124   ;;  %v50_v1 = vld [vmem:[#allocation5] sm:$0xf] }
   0xd   :  { %45 = vrot.lane.b32.xlu0 %v43_v0, %s202_s0  ;;  %s203_s22 = smov [#allocation7]   ;;  %s64_s1 = sshll.u32 %s239_s2, 4  ;;  %vm48_vm0 = vcmask 64512   ;;  %vm55_vm1 = vcmask 60416   ;;  %s65_s1 = int_to_ptr.hbm [resolvable:$true] %s64_s1 }
   0xe   :  { %s62_s23 = sshll.u32 %s203_s22, 4  ;;  %s204_s26 = smov [#allocation8]   ;;  %s63_s23 = int_to_ptr.vmem [resolvable:$true] %s62_s23 }
   0xf   :  { %s73_s27 = sshll.u32 %s204_s26, 4  ;;  %s75_s30 = sshll.u32 %s240_s3, 4  ;;  %s74_s27 = int_to_ptr.vmem [resolvable:$true] %s73_s27  ;;  %s76_s30 = int_to_ptr.hbm [resolvable:$true] %s75_s30 }
  0x15   :  { %52 = vrot.lane.b32.xlu0 %v50_v1, %s202_s0 }
  0x7f   :  { %v46_v2 = vpop.permute.xlu0 %45 }
  0x80   :  { %49 = vst.msk [vmem:[#allocation7] sm:$0xff] %vm48_vm0, %v46_v2 }
  0x81   :  { %67 = dma.vmem_to_hbm [thread:$0]  %s63_s23, 128, %s65_s1, [#allocation4]  }
  0x87   :  { %v53_v3 = vpop.permute.xlu0 %52 }
  0x88   :  { %56 = vst.msk [vmem:[#allocation8] sm:$0xf] %vm55_vm1, %v53_v3 }
  0x89   :  { %78 = dma.vmem_to_hbm [thread:$0]  %s74_s27, 64, %s76_s30, [#allocation9]  }
  0x8a   :  { %196 = dma.done.wait [#allocation4], 128  }
  0x8b   :  { %197 = vsyncadd [#allocation4], 4294967168 }
  0x8c   :  { %198 = dma.done.wait [#allocation9], 64  }
  0x8d   :  { %199 = vsyncadd [#allocation9], 4294967232 }
  0x8e   :  { %87 = vsyncpa [#allocation3], 1 }
  0x8f   :  { %88 = vsyncpa [#allocation6], 1 }
  0x90   :  { %89 = vsyncpa [#allocation4], 1 }
  0x91   :  { %90 = vsyncpa [#allocation9], 1 }

</bundles_post_ra>
